<compile_context>
chip_gen: v7x
topology: tpu7x:2x2x1
jax: 0.10.0
libtpu: 0.0.40
codegen_flags: <defaults>
</compile_context>

<pallas_src>
import math
import functools

import jax
import jax.numpy as jnp
from jax.experimental import pallas as pl
from jax.experimental.pallas import tpu as pltpu


# ---------------------------------------------------------------------------
# Parameter / buffer construction (plain JAX, deterministic).
# ---------------------------------------------------------------------------
def make_pos_embedding(emb_size: int, maxlen: int = 5000) -> jnp.ndarray:
    """Same math as the PyTorch __init__; returns the (maxlen, 1, emb_size) buffer."""
    den = jnp.exp(
        -jnp.arange(0, emb_size, 2, dtype=jnp.float32) * (math.log(10000.0) / emb_size)
    )
    pos = jnp.arange(0, maxlen, dtype=jnp.float32).reshape(maxlen, 1)
    pe = jnp.zeros((maxlen, emb_size), dtype=jnp.float32)
    pe = pe.at[:, 0::2].set(jnp.sin(pos * den))
    pe = pe.at[:, 1::2].set(jnp.cos(pos * den))
    return pe[:, None, :]  # (maxlen, 1, emb_size), matches register_buffer shape


# ---------------------------------------------------------------------------
# Kernels
# ---------------------------------------------------------------------------
def _add_pe_kernel(x_ref, pos_ref, o_ref):
    # x_ref: (ts, B, E); pos_ref: (ts, E).  Broadcasting over the batch axis
    # reproduces the unsqueeze(-2) broadcast of the original module.
    o_ref[...] = x_ref[...] + pos_ref[...][:, None, :]


def _add_pe_dropout_kernel(seed_ref, x_ref, pos_ref, o_ref, *, rate: float):
    # Training path: add + inverted dropout.
    # TODO(synk): PyTorch's nn.Dropout draws from the torch RNG stream; the
    # stateless counter-hash below has the same Bernoulli(keep) distribution
    # but different bit values.
    ts, B, E = x_ref.shape
    y = x_ref[...] + pos_ref[...][:, None, :]

    keep = 1.0 - rate
    thr = jnp.uint32(min(0xFFFFFFFF, int(round(keep * 2.0 ** 32))))
    inv_keep = jnp.asarray(1.0 / keep, dtype=y.dtype)

    # Global element index (tiling-invariant counter).
    shape = (ts, B, E)
    s_ids = jax.lax.broadcasted_iota(jnp.int32, shape, 0) + pl.program_id(0) * ts
    b_ids = jax.lax.broadcasted_iota(jnp.int32, shape, 1)
    e_ids = jax.lax.broadcasted_iota(jnp.int32, shape, 2)
    idx = (s_ids * B + b_ids) * E + e_ids

    # Seed mixed non-additively (golden-ratio multiply) then a splitmix32-style
    # finalizer -> consecutive integer seeds give decorrelated masks.
    h = idx.astype(jnp.uint32) ^ (seed_ref[0].astype(jnp.uint32) * jnp.uint32(0x9E3779B9))
    h = (h ^ (h >> 16)) * jnp.uint32(0x7FEB352D)
    h = (h ^ (h >> 15)) * jnp.uint32(0x846CA68B)
    h = h ^ (h >> 16)

    mask = h < thr                      # P(mask) == keep, single uint32 compare
    o_ref[...] = jnp.where(mask, y * inv_keep, jnp.zeros_like(y)).astype(o_ref.dtype)


# ---------------------------------------------------------------------------
# Tiling heuristic.
#   * ~4 MiB x-blocks (measured sweet spot for pure HBM streaming),
#   * sequence tile a multiple of 8 so the dense (ts, E) PE block keeps its
#     sublane dim aligned,
#   * total double-buffered VMEM (x + out + pe) kept under ~40 MiB so the same
#     tile is safe on v7x (64 MiB physical VMEM per TC),
#   * best-effort even grid length when >1 step (v7x megacore load balance).
# Note: x/out blocks use the full B as the sublane dim; if B is not a multiple
# of 8 (16 for 16-bit dtypes) stores become masked partial stores -- pad B
# upstream for peak store bandwidth.
# ---------------------------------------------------------------------------
def _round_up(x: int, m: int) -> int:
    return ((x + m - 1) // m) * m


def _choose_seq_tile(S: int, B: int, E: int, itemsize: int,
                     target_block_bytes: int = 4 << 20,
                     vmem_cap_bytes: int = 40 << 20) -> int:
    row_bytes = B * E * itemsize          # one seq row of x (and of out)
    pe_row_bytes = E * itemsize
    per_row_dblbuf = 2 * (2 * row_bytes + pe_row_bytes)

    max_rows_vmem = max(1, vmem_cap_bytes // per_row_dblbuf)
    target_rows = max(1, target_block_bytes // row_bytes)
    rows = min(target_rows, max_rows_vmem)

    ts = max(8, (rows // 8) * 8)          # multiple of 8 (PE block sublane-aligned)
    ts = min(ts, _round_up(S, 8))         # never bigger than needed

    # Best-effort: even number of grid steps when >1 (v7x has 2 TensorCores).
    n = -(-S // ts)
    if n > 1 and (n % 2) == 1:
        n += 1
        ts = min(ts, _round_up(-(-S // n), 8))
    return max(8, ts)


# ---------------------------------------------------------------------------
# Wrapper
# ---------------------------------------------------------------------------
def positional_encoding(
    token_embedding: jnp.ndarray,      # (S, B, E)
    pos_embedding: jnp.ndarray,        # (maxlen, 1, E) or (maxlen, E)
    *,
    dropout_rate: float = 0.1,
    training: bool = False,
    seed: int = 0,
    seq_tile: int | None = None,
    donate_input: bool = False,
):
    S, B, E = token_embedding.shape
    if pos_embedding.ndim == 3:                 # accept the torch-shaped buffer
        pos_embedding = pos_embedding[:, 0, :]  # -> dense (maxlen, E)
    maxlen = pos_embedding.shape[0]
    assert S <= maxlen, "sequence longer than the positional-encoding table"
    # Cast once in the wrapper (halves PE DMA for bf16 activations, removes
    # the per-element convert inside the kernel).
    pos_embedding = pos_embedding.astype(token_embedding.dtype)

    itemsize = token_embedding.dtype.itemsize
    if seq_tile is None:
        ts = _choose_seq_tile(S, B, E, itemsize)
    else:
        assert seq_tile > 0
        ts = seq_tile                      # multiple of 8 recommended
    n_blocks = pl.cdiv(S, ts)              # partial last block handled by masking
    grid = (n_blocks,)

    x_blk = ts * B * E * itemsize
    pe_blk = ts * E * itemsize
    vmem_bytes = 2 * (2 * x_blk + pe_blk) + (4 << 20)     # dbl-buffered + headroom
    vmem_bytes = int(min(max(vmem_bytes, 16 << 20), 48 << 20))

    cparams = pltpu.CompilerParams(
        dimension_semantics=("parallel",),
        vmem_limit_bytes=vmem_bytes,
    )
    out_shape = jax.ShapeDtypeStruct((S, B, E), token_embedding.dtype)

    if (not training) or dropout_rate <= 0.0:
        # Eval mode: dropout is identity -> just the broadcasted add.
        grid_spec = pltpu.PrefetchScalarGridSpec(
            num_scalar_prefetch=0,
            grid=grid,
            in_specs=[
                pl.BlockSpec((ts, B, E), lambda i: (i, 0, 0)),
                pl.BlockSpec((ts, E), lambda i: (i, 0)),
            ],
            out_specs=pl.BlockSpec((ts, B, E), lambda i: (i, 0, 0)),
        )
        return pl.pallas_call(
            _add_pe_kernel,
            grid_spec=grid_spec,
            out_shape=out_shape,
            compiler_params=cparams,
            input_output_aliases=({0: 0} if donate_input else {}),
        )(token_embedding, pos_embedding)

    # Training mode: add + inverted dropout, seed prefetched into SMEM.
    grid_spec = pltpu.PrefetchScalarGridSpec(
        num_scalar_prefetch=1,
        grid=grid,
        in_specs=[
            pl.BlockSpec((ts, B, E), lambda i, seed_ref: (i, 0, 0)),
            pl.BlockSpec((ts, E), lambda i, seed_ref: (i, 0)),
        ],
        out_specs=pl.BlockSpec((ts, B, E), lambda i, seed_ref: (i, 0, 0)),
    )
    return pl.pallas_call(
        functools.partial(_add_pe_dropout_kernel, rate=float(dropout_rate)),
        grid_spec=grid_spec,
        out_shape=out_shape,
        compiler_params=cparams,
        # Operand 0 is the prefetched seed, operand 1 is token_embedding.
        input_output_aliases=({1: 0} if donate_input else {}),
    )(jnp.array([seed], dtype=jnp.int32), token_embedding, pos_embedding)


# ---------------------------------------------------------------------------
# Demo / self-check
# ---------------------------------------------------------------------------
if __name__ == "__main__":
    # Lane-dense E (multiple of 128) and full-sublane B for f32.
    SEQ, BATCH, EMB = 16, 8, 128
    MAXLEN = 64
    DROPOUT = 0.1

    key = jax.random.PRNGKey(0)
    token_embedding = jax.random.normal(key, (SEQ, BATCH, EMB), dtype=jnp.float32)
    pos_embedding = make_pos_embedding(EMB, MAXLEN)   # (MAXLEN, 1, EMB)

    # Pure-JAX reference of the forward pass (eval mode: dropout == identity).
    ref = token_embedding + pos_embedding[:SEQ]

    # --- eval path ---------------------------------------------------------
    out = positional_encoding(
        token_embedding, pos_embedding, dropout_rate=DROPOUT, training=False
    )
    out = jax.block_until_ready(out)
    assert out.shape == (SEQ, BATCH, EMB)
    assert out.dtype == token_embedding.dtype
    assert jnp.allclose(out, ref, atol=1e-6, rtol=1e-6)

    # --- eval path with a partial last block (cdiv grid, S not divisible) ---
    SEQ2 = 20
    key2 = jax.random.PRNGKey(1)
    token2 = jax.random.normal(key2, (SEQ2, BATCH, EMB), dtype=jnp.float32)
    ref2 = token2 + pos_embedding[:SEQ2]
    out2 = positional_encoding(
        token2, pos_embedding, dropout_rate=DROPOUT, training=False, seq_tile=8
    )
    out2 = jax.block_until_ready(out2)
    assert jnp.allclose(out2, ref2, atol=1e-6, rtol=1e-6)

    # --- training path (distribution-level check) ---------------------------
    out_tr = positional_encoding(
        token_embedding, pos_embedding, dropout_rate=DROPOUT, training=True, seed=123
    )
    out_tr = jax.block_until_ready(out_tr)
    keep = 1.0 - DROPOUT
    # Every element is either dropped (0) or the broadcast-add scaled by 1/keep.
    ok_elem = jnp.isclose(out_tr, 0.0) | jnp.isclose(out_tr, ref / keep, atol=1e-5, rtol=1e-5)
    assert bool(jnp.all(ok_elem))
    drop_frac = float(jnp.mean((out_tr == 0.0).astype(jnp.float32)))
    assert 0.02 < drop_frac < 0.3, f"unexpected drop fraction {drop_frac}"

    print("KERNEL_OK")
</pallas_src>

<mosaic_0001>
module attributes {stable_mosaic.version = 11 : i64} {
  func.func @_add_pe_kernel(%arg0: i32, %arg1: memref<16x8x128xf32, #tpu.memory_space<vmem>>, %arg2: memref<16x128xf32, #tpu.memory_space<vmem>>, %arg3: memref<16x8x128xf32, #tpu.memory_space<vmem>>) attributes {dimension_semantics = [#tpu.dimension_semantics<parallel>], iteration_bounds = array<i64: 1>, scalar_prefetch = 0 : i64, scratch_operands = 0 : i64, tpu.core_type = #tpu.core_type<tc>, window_params = [{transform_indices = @transform_0, window_bounds = array<i64: 16, 8, 128>}, {transform_indices = @transform_1, window_bounds = array<i64: 16, 128>}, {transform_indices = @transform_2, window_bounds = array<i64: 16, 8, 128>}]} {
    %c0 = arith.constant 0 : index
    %c0_0 = arith.constant 0 : index
    %c0_1 = arith.constant 0 : index
    %0 = vector.load %arg1[%c0, %c0_0, %c0_1] : memref<16x8x128xf32, #tpu.memory_space<vmem>>, vector<16x8x128xf32>
    %c0_2 = arith.constant 0 : index
    %c0_3 = arith.constant 0 : index
    %1 = vector.load %arg2[%c0_2, %c0_3] : memref<16x128xf32, #tpu.memory_space<vmem>>, vector<16x128xf32>
    %2 = vector.shape_cast %1 : vector<16x128xf32> to vector<16x1x128xf32>
    %3 = vector.broadcast %2 : vector<16x1x128xf32> to vector<16x8x128xf32>
    %4 = arith.addf %0, %3 : vector<16x8x128xf32>
    %c0_4 = arith.constant 0 : index
    %c0_5 = arith.constant 0 : index
    %c0_6 = arith.constant 0 : index
    %5 = vector.load %arg3[%c0_4, %c0_5, %c0_6] : memref<16x8x128xf32, #tpu.memory_space<vmem>>, vector<16x8x128xf32>
    tpu.vector_store %arg3[%c0_4, %c0_5, %c0_6], %4 {strides = array<i32>} : memref<16x8x128xf32, #tpu.memory_space<vmem>>, vector<16x8x128xf32>,
    return
  }
  func.func @transform_0(%arg0: i32) -> (i32, i32, i32) {
    %c0_i32 = arith.constant 0 : i32
    %c0_i32_0 = arith.constant 0 : i32
    %c0_i32_1 = arith.constant 0 : i32
    return %arg0, %c0_i32, %c0_i32_0 : i32, i32, i32
  }
  func.func @transform_1(%arg0: i32) -> (i32, i32) {
    %c0_i32 = arith.constant 0 : i32
    %c0_i32_0 = arith.constant 0 : i32
    return %arg0, %c0_i32 : i32, i32
  }
  func.func @transform_2(%arg0: i32) -> (i32, i32, i32) {
    %c0_i32 = arith.constant 0 : i32
    %c0_i32_0 = arith.constant 0 : i32
    %c0_i32_1 = arith.constant 0 : i32
    return %arg0, %c0_i32, %c0_i32_0 : i32, i32, i32
  }
}

</mosaic_0001>

<bundles_post_ra>
// kernel: tpu_custom_call.1
= control target key start
LH: loop header
LB: loop body
LE: loop exit
PB: predicated region body
PF: predicated region fallthrough
CT: control target
= control target key end

     0   :  { %7 = vsyncpa [#allocation3], 0  ;;  %s469_s0 = inlined_call_operand.hbm [shape: f32[16,8,128], index: 0, kind: input, shape index: {}]   ;;  %s470_s1 = inlined_call_operand.hbm [shape: f32[64,128], index: 1, kind: input, shape index: {}]   ;;  %s471_s2 = inlined_call_operand.hbm [shape: f32[16,8,128], index: 2, kind: output, shape index: {}]  }
   0x1   :  { %8 = vsyncpa [#allocation6], 0 }
   0x2   :  { %9 = vsyncpa [#allocation4], 0  ;;  %s368_s9 = smov [#allocation2]   ;;  %s296_s13 = scalar_lea.hbm %s469_s0, 2048 }
   0x3   :  { %s15_s10 = sshll.u32 %s368_s9, 4  ;;  %p297_p0 = scmp.ne.s32.totalorder %s469_s0, %s296_s13  ;;  %s16_s10 = int_to_ptr.vmem [resolvable:$true] %s15_s10 }
   0x4   :  { %p300_p1 = scmp.lt.u32.totalorder %s296_s13, %s469_s0 }
   0x6   :  { %p302_p2 = pnand %p300_p1, %p297_p0 }
   0x8   :  { %305 = shalt.err (!%p302_p2)
}
   0x9   :  { %s306_s18 = scalar_lea.vmem %s16_s10, 2048  ;;  %p311_p4 = scmp.lt.s32.totalorder %s16_s10, %s16_s10 }
   0xa   :  { %p307_p3 = scmp.ne.s32.totalorder %s16_s10, %s306_s18  ;;  %p312_p5 = scmp.lt.s32.totalorder %s306_s18, %s306_s18 }
   0xc   :  { %p313_p6 = por %p312_p5, %p311_p4 }
   0xe   :  { %p314_p7 = pnand %p313_p6, %p307_p3 }
  0x10   :  { %317 = shalt.err (!%p314_p7)
}
  0x11   :  { %s369_s19 = smov 128   ;;  %s370_s20 = smov 8  }
  0x12   :  { %21 = dma.hbm_to_vmem [thread:$0]  %s469_s0, 2048, %s16_s10, [#allocation3], %s369_s19, %s369_s19, %s370_s20  }
  0x13   :  { %s371_s23 = smov [#allocation5]   ;;  %s318_s27 = scalar_lea.hbm %s470_s1, 256 }
  0x14   :  { %s27_s24 = sshll.u32 %s371_s23, 4  ;;  %p319_p8 = scmp.ne.s32.totalorder %s470_s1, %s318_s27  ;;  %s28_s24 = int_to_ptr.vmem [resolvable:$true] %s27_s24 }
  0x15   :  { %s320_s4 = scalar_lea.hbm %s470_s1, 1024  ;;  %p322_p10 = scmp.lt.u32.totalorder %s318_s27, %s470_s1 }
  0x16   :  { %p321_p9 = scmp.lt.u32.totalorder %s320_s4, %s318_s27 }
  0x18   :  { %p323_p11 = por %p322_p10, %p321_p9 }
  0x1a   :  { %p324_p12 = pnand %p323_p11, %p319_p8 }
  0x1c   :  { %327 = shalt.err (!%p324_p12)
}
  0x1d   :  { %s328_s0 = scalar_lea.vmem %s28_s24, 256  ;;  %p333_p0 = scmp.lt.s32.totalorder %s28_s24, %s28_s24 }
  0x1e   :  { %p329_p13 = scmp.ne.s32.totalorder %s28_s24, %s328_s0  ;;  %p334_p1 = scmp.lt.s32.totalorder %s328_s0, %s328_s0 }
  0x20   :  { %p335_p2 = por %p334_p1, %p333_p0 }
  0x22   :  { %p336_p3 = pnand %p335_p2, %p329_p13 }
  0x24   :  { %339 = shalt.err (!%p336_p3)
}
  0x25   :  { %33 = dma.hbm_to_vmem [thread:$0]  %s470_s1, 256, %s28_s24, [#allocation6], %s369_s19, %s369_s19, %s370_s20  }
  0x26   :  { %362 = dma.done.wait [#allocation3], 2048  }
  0x27   :  { %363 = vsyncadd [#allocation3], 4294965248 }
  0x28   :  { %364 = dma.done.wait [#allocation6], 256  }
  0x29   :  { %365 = vsyncadd [#allocation6], 4294967040  ;;  %v64_v0 = vlaneseq  ;;  %v372_v1 = vmov 1966171168   ;;  %v56_v6 = vld [vmem:[#allocation5] sm:$0xff]  ;;  %v57_v13 = vld [vmem:[#allocation5 + $0x8] sm:$0xff] }
  0x2a   :  { %v62_v2 = vunpack.c.l.s4 %v372_v1  ;;  %v60_v9 = vcombine.high %v56_v6, %v56_v6  ;;  %v40_v14 = vld [vmem:[#allocation2] sm:$0xff]  ;;  %v109_v16 = vcombine.high %v57_v13, %v57_v13  ;;  %v41_v21 = vld [vmem:[#allocation2 + $0x8] sm:$0xff]  ;;  %v42_v22 = vld [vmem:[#allocation2 + $0x10] sm:$0xff]  ;;  %s373_s1 = smov [#allocation7]  }
  0x2b   :  { %v65_v3 = vshrl.u32 %v64_v0, 7  ;;  %v44_v31 = vld [vmem:[#allocation2 + $0x20] sm:$0xff]  ;;  %v43_v32 = vld [vmem:[#allocation2 + $0x18] sm:$0xff]  ;;  %v45_v41 = vld [vmem:[#allocation2 + $0x28] sm:$0xff]  ;;  %s275_s9 = sshll.u32 %s373_s1, 4  ;;  %s276_s9 = int_to_ptr.vmem [resolvable:$true] %s275_s9 }
  0x2c   :  { %v63_v4 = vunpack.c.0.s8 %v62_v2  ;;  %v48_v36 = vld [vmem:[#allocation2 + $0x40] sm:$0xff]  ;;  %v46_v42 = vld [vmem:[#allocation2 + $0x30] sm:$0xff]  ;;  %v49_v48 = vld [vmem:[#allocation2 + $0x48] sm:$0xff]  ;;  %s340_s10 = scalar_lea.vmem %s276_s9, 2048  ;;  %p345_p5 = scmp.lt.s32.totalorder %s276_s9, %s276_s9 }
  0x2d   :  { %v425_v8 = vsub.s32 0, %v65_v3  ;;  %v47_v50 = vld [vmem:[#allocation2 + $0x38] sm:$0xff]  ;;  %v50_v57 = vld [vmem:[#allocation2 + $0x50] sm:$0xff]  ;;  %v52_v2 = vld [vmem:[#allocation2 + $0x60] sm:$0xff]  ;;  %p341_p4 = scmp.ne.s32.totalorder %s276_s9, %s340_s10  ;;  %p346_p6 = scmp.lt.s32.totalorder %s340_s10, %s340_s10 }
  0x2e   :  { %v422_v5 = vsub.s32 %v63_v4, %v65_v3  ;;  %v51_v61 = vld [vmem:[#allocation2 + $0x58] sm:$0xff] }
  0x2f   :  { %p347_p7 = por %p346_p6, %p345_p5 }
  0x30   :  { %v67_v7 = vrot.slane %v56_v6, %v422_v5  ;;  %v74_v12 = vrot.slane %v60_v9, %v422_v5  ;;  %v116_v15 = vrot.slane %v57_v13, %v422_v5  ;;  %v123_v26 = vrot.slane %v109_v16, %v422_v5  ;;  %v55_v16 = vld [vmem:[#allocation2 + $0x78] sm:$0xff] }
  0x31   :  { %p348_p8 = pnand %p347_p7, %p341_p4 }
  0x32   :  { %v83_v10 = vrot.slane %v67_v7, %v422_v5  ;;  %v75_v11 = vcombine.high %v67_v7, %v67_v7  ;;  %v90_v20 = vrot.slane %v74_v12, %v422_v5  ;;  %v76_v23 = vcombine.high %v74_v12, %v74_v12 }
  0x33   :  { %v132_v24 = vrot.slane %v116_v15, %v422_v5  ;;  %v124_v25 = vcombine.high %v116_v15, %v116_v15  ;;  %v139_v62 = vrot.slane %v123_v26, %v422_v5  ;;  %v125_v63 = vcombine.high %v123_v26, %v123_v26 }
  0x34   :  { %v161_v17 = vrot.slane %v83_v10, %v425_v8  ;;  %v97_v18 = vrot.slane %v75_v11, %v422_v5  ;;  %v105_v19 = vcombine.high %v83_v10, %v83_v10  ;;  %v177_v33 = vrot.slane %v90_v20, %v425_v8  ;;  %v53_v10 = vld [vmem:[#allocation2 + $0x68] sm:$0xff]  ;;  %v54_v11 = vld [vmem:[#allocation2 + $0x70] sm:$0xff] }
  0x35   :  { %v104_v34 = vrot.slane %v76_v23, %v422_v5  ;;  %v106_v35 = vcombine.high %v90_v20, %v90_v20  ;;  %v193_v37 = vrot.slane %v132_v24, %v425_v8  ;;  %v146_v43 = vrot.slane %v124_v25, %v422_v5 }
  0x36   :  { %v238_v27 = vadd.f32 %v161_v17, %v40_v14  ;;  %v165_v28 = vrot.slane %v97_v18, %v425_v8  ;;  %v169_v29 = vrot.slane %v105_v19, %v425_v8  ;;  %v107_v30 = vcombine.high %v97_v18, %v97_v18 }
  0x37   :  { %v242_v44 = vadd.f32 %v177_v33, %v44_v31  ;;  %v181_v45 = vrot.slane %v104_v34, %v425_v8  ;;  %v185_v46 = vrot.slane %v106_v35, %v425_v8  ;;  %v108_v47 = vcombine.high %v104_v34, %v104_v34 }
  0x38   :  { %254 = vst [vmem:[#allocation7] sm:$0xff] %v238_v27  ;;  %v239_v38 = vadd.f32 %v165_v28, %v41_v21  ;;  %v240_v39 = vadd.f32 %v169_v29, %v42_v22  ;;  %v173_v40 = vrot.slane %v107_v30, %v425_v8  ;;  %v246_v51 = vadd.f32 %v193_v37, %v48_v36 }
  0x39   :  { %v197_v52 = vrot.slane %v146_v43, %v425_v8  ;;  %v154_v53 = vcombine.high %v132_v24, %v132_v24  ;;  %258 = vst [vmem:[#allocation7 + $0x20] sm:$0xff] %v242_v44  ;;  %v243_v54 = vadd.f32 %v181_v45, %v45_v41  ;;  %v244_v55 = vadd.f32 %v185_v46, %v46_v42 }
  0x3a   :  { %255 = vst [vmem:[#allocation7 + $0x8] sm:$0xff] %v239_v38  ;;  %256 = vst [vmem:[#allocation7 + $0x10] sm:$0xff] %v240_v39  ;;  %v241_v49 = vadd.f32 %v173_v40, %v43_v32  ;;  %v189_v56 = vrot.slane %v108_v47, %v425_v8  ;;  %v156_v58 = vcombine.high %v146_v43, %v146_v43 }
  0x3b   :  { %262 = vst [vmem:[#allocation7 + $0x40] sm:$0xff] %v246_v51  ;;  %v247_v59 = vadd.f32 %v197_v52, %v49_v48  ;;  %v201_v60 = vrot.slane %v154_v53, %v425_v8  ;;  %259 = vst [vmem:[#allocation7 + $0x28] sm:$0xff] %v243_v54  ;;  %v209_v4 = vrot.slane %v139_v62, %v425_v8 }
  0x3c   :  { %257 = vst [vmem:[#allocation7 + $0x18] sm:$0xff] %v241_v49  ;;  %260 = vst [vmem:[#allocation7 + $0x30] sm:$0xff] %v244_v55  ;;  %v245_v0 = vadd.f32 %v189_v56, %v47_v50  ;;  %v205_v1 = vrot.slane %v156_v58, %v425_v8  ;;  %v153_v6 = vrot.slane %v125_v63, %v422_v5 }
  0x3d   :  { %263 = vst [vmem:[#allocation7 + $0x48] sm:$0xff] %v247_v59  ;;  %v248_v3 = vadd.f32 %v201_v60, %v50_v57  ;;  %v155_v7 = vcombine.high %v139_v62, %v139_v62  ;;  %v250_v12 = vadd.f32 %v209_v4, %v52_v2 }
  0x3e   :  { %261 = vst [vmem:[#allocation7 + $0x38] sm:$0xff] %v245_v0  ;;  %v249_v9 = vadd.f32 %v205_v1, %v51_v61  ;;  %v213_v13 = vrot.slane %v153_v6, %v425_v8  ;;  %v157_v15 = vcombine.high %v153_v6, %v153_v6 }
  0x3f   :  { %264 = vst [vmem:[#allocation7 + $0x50] sm:$0xff] %v248_v3  ;;  %v217_v14 = vrot.slane %v155_v7, %v425_v8  ;;  %266 = vst [vmem:[#allocation7 + $0x60] sm:$0xff] %v250_v12 }
  0x40   :  { %265 = vst [vmem:[#allocation7 + $0x58] sm:$0xff] %v249_v9  ;;  %v251_v17 = vadd.f32 %v213_v13, %v53_v10  ;;  %v221_v5 = vrot.slane %v157_v15, %v425_v8 }
  0x41   :  { %v252_v18 = vadd.f32 %v217_v14, %v54_v11 }
  0x42   :  { %267 = vst [vmem:[#allocation7 + $0x68] sm:$0xff] %v251_v17  ;;  %v253_v19 = vadd.f32 %v221_v5, %v55_v16 }
  0x43   :  { %268 = vst [vmem:[#allocation7 + $0x70] sm:$0xff] %v252_v18 }
  0x44   :  { %269 = vst [vmem:[#allocation7 + $0x78] sm:$0xff] %v253_v19 }
  0x45   :  { %351 = shalt.err (!%p348_p8)
}
  0x46   :  { %s352_s13 = scalar_lea.hbm %s471_s2, 2048 }
  0x47   :  { %p353_p9 = scmp.ne.s32.totalorder %s471_s2, %s352_s13  ;;  %p356_p10 = scmp.lt.u32.totalorder %s352_s13, %s471_s2 }
  0x49   :  { %p358_p11 = pnand %p356_p10, %p353_p9 }
  0x4b   :  { %361 = shalt.err (!%p358_p11)
}
  0x4c   :  { %281 = dma.vmem_to_hbm [thread:$0]  %s276_s9, 2048, %s471_s2, [#allocation4], %s369_s19, %s369_s19, %s370_s20  }
  0x4d   :  { %366 = dma.done.wait [#allocation4], 2048  }
  0x4e   :  { %367 = vsyncadd [#allocation4], 4294965248 }
  0x4f   :  { %285 = vsyncpa [#allocation3], 1 }
  0x50   :  { %286 = vsyncpa [#allocation6], 1 }
  0x51   :  { %287 = vsyncpa [#allocation4], 1 }

</bundles_post_ra>
